<compile_context>
chip_gen: v7x
topology: tpu7x:2x2x1
jax: 0.10.0
libtpu: 0.0.40
codegen_flags: <defaults>
</compile_context>

<pallas_src>
import functools

import jax
import jax.numpy as jnp
from jax.experimental import pallas as pl
from jax.experimental.pallas import tpu as pltpu


def _in_rows_kernel(x_ref, o_ref, *, eps, inv_n):
    # x_ref: (TILE_R, HW) -- each row is one (b, c) spatial plane.
    x = x_ref[...].astype(jnp.float32)
    mean = jnp.sum(x, axis=-1, keepdims=True) * inv_n
    xc = x - mean
    var = jnp.sum(xc * xc, axis=-1, keepdims=True) * inv_n  # unbiased=False
    y = xc * jax.lax.rsqrt(var + eps)
    o_ref[...] = y.astype(o_ref.dtype)


def _in_rows_kernel_affine(x_ref, g_ref, b_ref, o_ref, *, eps, inv_n):
    # x_ref: (TILE_R, HW); g_ref/b_ref: (TILE_R, 1) per-row scale/shift.
    x = x_ref[...].astype(jnp.float32)
    mean = jnp.sum(x, axis=-1, keepdims=True) * inv_n
    xc = x - mean
    var = jnp.sum(xc * xc, axis=-1, keepdims=True) * inv_n  # unbiased=False
    # Fold gamma into the normalization factor: one fewer full-width multiply.
    scale = jax.lax.rsqrt(var + eps) * g_ref[...]            # (TILE_R, 1)
    y = xc * scale + b_ref[...]                               # broadcast over lanes
    o_ref[...] = y.astype(o_ref.dtype)


def _pick_tile_rows(n_rows, hw, itemsize):
    """Rows per block: ~2 MiB input tile, sublane-aligned, legal per (8,128) rule."""
    target_bytes = 2 << 20
    rows = max(1, target_bytes // max(1, hw * itemsize))
    if n_rows <= 8:
        # block dim == full array dim is always legal, even if < 8.
        return n_rows
    rows = min(rows, n_rows)
    rows = max(8, (rows // 8) * 8)  # multiple of 8 (sublanes)
    return rows


def my_instance_norm(x, gamma=None, beta=None, *, eps=1e-5, affine=False,
                     inplace=False):
    """Pallas InstanceNorm. x: (B, C, H, W). gamma/beta: (1, C, 1, 1) if affine."""
    B, C, H, W = x.shape
    R, HW = B * C, H * W

    x2 = x.reshape(R, HW)  # free for contiguous NCHW
    tile_r = _pick_tile_rows(R, HW, x.dtype.itemsize)
    grid = (pl.cdiv(R, tile_r),)
    inv_n = 1.0 / float(HW)

    x_spec = pl.BlockSpec((tile_r, HW), lambda i: (i, 0))
    out_spec = pl.BlockSpec((tile_r, HW), lambda i: (i, 0))
    cparams = pltpu.CompilerParams(
        dimension_semantics=("parallel",),      # v7x: shard row tiles across 2 TCs
        vmem_limit_bytes=32 * 1024 * 1024,      # headroom above v5e default, safe on v7x
    )
    out_shape = jax.ShapeDtypeStruct((R, HW), x.dtype)
    io_alias = {0: 0} if inplace else {}

    if affine:
        # Row r corresponds to channel r % C; build per-row gamma/beta once.
        g_rows = jnp.tile(gamma.reshape(C).astype(jnp.float32), B).reshape(R, 1)
        b_rows = jnp.tile(beta.reshape(C).astype(jnp.float32), B).reshape(R, 1)
        p_spec = pl.BlockSpec((tile_r, 1), lambda i: (i, 0))
        y2 = pl.pallas_call(
            functools.partial(_in_rows_kernel_affine, eps=eps, inv_n=inv_n),
            out_shape=out_shape,
            grid=grid,
            in_specs=[x_spec, p_spec, p_spec],
            out_specs=out_spec,
            compiler_params=cparams,
            input_output_aliases=io_alias,
        )(x2, g_rows, b_rows)
    else:
        y2 = pl.pallas_call(
            functools.partial(_in_rows_kernel, eps=eps, inv_n=inv_n),
            out_shape=out_shape,
            grid=grid,
            in_specs=[x_spec],
            out_specs=out_spec,
            compiler_params=cparams,
            input_output_aliases=io_alias,
        )(x2)

    return y2.reshape(B, C, H, W)


def _reference(x, gamma=None, beta=None, *, eps=1e-5, affine=False):
    mean = jnp.mean(x, axis=(2, 3), keepdims=True)
    var = jnp.mean((x - mean) ** 2, axis=(2, 3), keepdims=True)
    y = (x - mean) / jnp.sqrt(var + eps)
    if affine:
        y = y * gamma + beta
    return y


if __name__ == "__main__":
    B, C, H, W = 2, 4, 16, 16
    key = jax.random.PRNGKey(0)
    x = jax.random.normal(key, (B, C, H, W), dtype=jnp.float32)

    # Deterministic parameter init, matching MyInstanceNorm.__init__ (affine=True)
    gamma = jnp.ones((1, C, 1, 1), dtype=jnp.float32)
    beta = jnp.zeros((1, C, 1, 1), dtype=jnp.float32)

    # Non-affine path (module default)
    y_plain = my_instance_norm(x, eps=1e-5, affine=False)
    y_plain = jax.block_until_ready(y_plain)
    ref_plain = _reference(x, eps=1e-5, affine=False)
    assert jnp.allclose(y_plain, ref_plain, atol=1e-5, rtol=1e-5)

    # Affine path
    y_aff = my_instance_norm(x, gamma, beta, eps=1e-5, affine=True)
    y_aff = jax.block_until_ready(y_aff)
    ref_aff = _reference(x, gamma, beta, eps=1e-5, affine=True)
    assert jnp.allclose(y_aff, ref_aff, atol=1e-5, rtol=1e-5)

    print("KERNEL_OK")
</pallas_src>

<mosaic_0001>
module attributes {stable_mosaic.version = 11 : i64} {
  func.func @_in_rows_kernel(%arg0: i32, %arg1: memref<8x256xf32, #tpu.memory_space<vmem>>, %arg2: memref<8x256xf32, #tpu.memory_space<vmem>>) attributes {dimension_semantics = [#tpu.dimension_semantics<parallel>], iteration_bounds = array<i64: 1>, scalar_prefetch = 0 : i64, scratch_operands = 0 : i64, tpu.core_type = #tpu.core_type<tc>, window_params = [{transform_indices = @transform_0, window_bounds = array<i64: 8, 256>}, {transform_indices = @transform_1, window_bounds = array<i64: 8, 256>}]} {
    %c0 = arith.constant 0 : index
    %c0_0 = arith.constant 0 : index
    %0 = vector.load %arg1[%c0, %c0_0] : memref<8x256xf32, #tpu.memory_space<vmem>>, vector<8x256xf32>
    %cst = arith.constant dense<0.000000e+00> : vector<8xf32>
    %1 = vector.multi_reduction <add>, %0, %cst [1] : vector<8x256xf32> to vector<8xf32>
    %2 = vector.shape_cast %1 : vector<8xf32> to vector<8x1xf32>
    %cst_1 = arith.constant 3.906250e-03 : f32
    %3 = vector.broadcast %cst_1 : f32 to vector<8x1xf32>
    %4 = arith.mulf %2, %3 : vector<8x1xf32>
    %5 = vector.broadcast %4 : vector<8x1xf32> to vector<8x256xf32>
    %6 = arith.subf %0, %5 : vector<8x256xf32>
    %7 = arith.mulf %6, %6 : vector<8x256xf32>
    %cst_2 = arith.constant dense<0.000000e+00> : vector<8xf32>
    %8 = vector.multi_reduction <add>, %7, %cst_2 [1] : vector<8x256xf32> to vector<8xf32>
    %9 = vector.shape_cast %8 : vector<8xf32> to vector<8x1xf32>
    %cst_3 = arith.constant 3.906250e-03 : f32
    %10 = vector.broadcast %cst_3 : f32 to vector<8x1xf32>
    %11 = arith.mulf %9, %10 : vector<8x1xf32>
    %cst_4 = arith.constant 9.99999974E-6 : f32
    %12 = vector.broadcast %cst_4 : f32 to vector<8x1xf32>
    %13 = arith.addf %11, %12 : vector<8x1xf32>
    %14 = math.rsqrt %13 : vector<8x1xf32>
    %15 = vector.broadcast %14 : vector<8x1xf32> to vector<8x256xf32>
    %16 = arith.mulf %6, %15 : vector<8x256xf32>
    %c0_5 = arith.constant 0 : index
    %c0_6 = arith.constant 0 : index
    %17 = vector.load %arg2[%c0_5, %c0_6] : memref<8x256xf32, #tpu.memory_space<vmem>>, vector<8x256xf32>
    tpu.vector_store %arg2[%c0_5, %c0_6], %16 {strides = array<i32>} : memref<8x256xf32, #tpu.memory_space<vmem>>, vector<8x256xf32>,
    return
  }
  func.func @transform_0(%arg0: i32) -> (i32, i32) {
    %c0_i32 = arith.constant 0 : i32
    %c0_i32_0 = arith.constant 0 : i32
    return %arg0, %c0_i32 : i32, i32
  }
  func.func @transform_1(%arg0: i32) -> (i32, i32) {
    %c0_i32 = arith.constant 0 : i32
    %c0_i32_0 = arith.constant 0 : i32
    return %arg0, %c0_i32 : i32, i32
  }
}

</mosaic_0001>

<bundles_post_ra>
// kernel: tpu_custom_call.1
= control target key start
LH: loop header
LB: loop body
LE: loop exit
PB: predicated region body
PF: predicated region fallthrough
CT: control target
= control target key end

     0   :  { %6 = vsyncpa [#allocation3], 0  ;;  %s144_s0 = inlined_call_operand.hbm [shape: f32[8,256], index: 0, kind: input, shape index: {}]   ;;  %s145_s1 = inlined_call_operand.hbm [shape: f32[8,256], index: 1, kind: output, shape index: {}]  }
   0x1   :  { %7 = vsyncpa [#allocation4], 0  ;;  %s108_s6 = smov [#allocation2]   ;;  %s60_s10 = scalar_lea.hbm %s144_s0, 256 }
   0x2   :  { %s14_s7 = sshll.u32 %s108_s6, 4  ;;  %p61_p0 = scmp.ne.s32.totalorder %s144_s0, %s60_s10  ;;  %s15_s7 = int_to_ptr.vmem [resolvable:$true] %s14_s7 }
   0x3   :  { %p64_p1 = scmp.lt.u32.totalorder %s60_s10, %s144_s0 }
   0x5   :  { %p66_p2 = pnand %p64_p1, %p61_p0 }
   0x7   :  { %69 = shalt.err (!%p66_p2)
}
   0x8   :  { %s70_s15 = scalar_lea.vmem %s15_s7, 256  ;;  %p75_p4 = scmp.lt.s32.totalorder %s15_s7, %s15_s7 }
   0x9   :  { %p71_p3 = scmp.ne.s32.totalorder %s15_s7, %s70_s15  ;;  %p76_p5 = scmp.lt.s32.totalorder %s70_s15, %s70_s15 }
   0xb   :  { %p77_p6 = por %p76_p5, %p75_p4 }
   0xd   :  { %p78_p7 = pnand %p77_p6, %p71_p3 }
   0xf   :  { %81 = shalt.err (!%p78_p7)
}
  0x10   :  { %17 = dma.hbm_to_vmem [thread:$0]  %s144_s0, 256, %s15_s7, [#allocation3]  }
  0x11   :  { %104 = dma.done.wait [#allocation3], 256  }
  0x12   :  { %105 = vsyncadd [#allocation3], 4294967040  ;;  %v21_v0 = vld [vmem:[#allocation2] sm:$0xff]  ;;  %v22_v1 = vld [vmem:[#allocation2 + $0x8] sm:$0xff]  ;;  %s109_s18 = smov [#allocation5]  }
  0x13   :  { %v23_v2 = vadd.f32 %v22_v1, %v21_v0  ;;  %s47_s0 = sshll.u32 %s109_s18, 4  ;;  %s48_s0 = int_to_ptr.vmem [resolvable:$true] %s47_s0 }
  0x14   :  { %s82_s19 = scalar_lea.vmem %s48_s0, 256  ;;  %p87_p9 = scmp.lt.s32.totalorder %s48_s0, %s48_s0 }
  0x15   :  { %24 = vadd.xlane.f32.xlu0 %v23_v2  ;;  %p83_p8 = scmp.ne.s32.totalorder %s48_s0, %s82_s19  ;;  %p88_p10 = scmp.lt.s32.totalorder %s82_s19, %s82_s19 }
  0x17   :  { %p89_p11 = por %p88_p10, %p87_p9 }
  0x19   :  { %p90_p12 = pnand %p89_p11, %p83_p8 }
  0xa2   :  { %v25_v3 = vpop.xlane.xlu0 %24 }
  0xa3   :  { %v26_v4 = vmul.f32 0.00390625, %v25_v3 }
  0xa5   :  { %v27_v5 = vsub.f32 %v21_v0, %v26_v4  ;;  %v28_v6 = vsub.f32 %v22_v1, %v26_v4 }
  0xa7   :  { %v29_v7 = vmul.f32 %v27_v5, %v27_v5  ;;  %v30_v8 = vmul.f32 %v28_v6, %v28_v6 }
  0xa9   :  { %v31_v9 = vadd.f32 %v30_v8, %v29_v7 }
  0xab   :  { %32 = vadd.xlane.f32.xlu0 %v31_v9 }
 0x138   :  { %v33_v10 = vpop.xlane.xlu0 %32 }
 0x139   :  { %v34_v11 = vmul.f32 0.00390625, %v33_v10 }
 0x13b   :  { %v35_v12 = vadd.f32 1e-05, %v34_v11 }
 0x13d   :  { %58 = vrsqrt.f32 %v35_v12 }
 0x147   :  { %v59_v13 = vpop.eup %58 }
 0x148   :  { %v37_v14 = vmul.f32 %v59_v13, %v27_v5  ;;  %v38_v15 = vmul.f32 %v59_v13, %v28_v6 }
 0x14a   :  { %39 = vst [vmem:[#allocation5] sm:$0xff] %v37_v14  ;;  %40 = vst [vmem:[#allocation5 + $0x8] sm:$0xff] %v38_v15 }
 0x14b   :  { %93 = shalt.err (!%p90_p12)
}
 0x14c   :  { %s94_s22 = scalar_lea.hbm %s145_s1, 256 }
 0x14d   :  { %p95_p13 = scmp.ne.s32.totalorder %s145_s1, %s94_s22  ;;  %p98_p0 = scmp.lt.u32.totalorder %s94_s22, %s145_s1 }
 0x14f   :  { %p100_p1 = pnand %p98_p0, %p95_p13 }
 0x151   :  { %103 = shalt.err (!%p100_p1)
}
 0x152   :  { %50 = dma.vmem_to_hbm [thread:$0]  %s48_s0, 256, %s145_s1, [#allocation4]  }
 0x153   :  { %106 = dma.done.wait [#allocation4], 256  }
 0x154   :  { %107 = vsyncadd [#allocation4], 4294967040 }
 0x155   :  { %54 = vsyncpa [#allocation3], 1 }
 0x156   :  { %55 = vsyncpa [#allocation4], 1 }

</bundles_post_ra>
